<compile_context>
chip_gen: v5e
topology: v5e:2x2
jax: 0.10.0
libtpu: 0.0.40
codegen_flags: <defaults>
</compile_context>

<pallas_src>
import functools

import jax
import jax.numpy as jnp
import numpy as np
from jax.experimental import pallas as pl
from jax.experimental.pallas import tpu as pltpu


def _attention_kernel(x_ref, wqkv_ref, wo_ref, bo_ref, o_ref, attn_ref,
                      *, n_heads: int, head_dim: int):
    """One grid step processes a (Bt, S, D) batch tile.

    x_ref   : (Bt, S, D)   f32 input tile
    wqkv_ref: (D, 3D)      bf16 fused, pre-transposed Q/K/V weights
    wo_ref  : (D, D)       bf16 pre-transposed output weight
    bo_ref  : (1, D)       f32 output bias
    o_ref   : (Bt, S, D)   f32 output tile
    attn_ref: (Bt*S, D)    f32 VMEM scratch (per-head outputs, lane-sliced writes)
    """
    Bt, S, D = x_ref.shape
    rows = Bt * S

    # Merge batch/seq (leading dims only -> no relayout), cast to bf16 for the MXU.
    x2 = x_ref[...].reshape(rows, D).astype(jnp.bfloat16)

    # Fused Q/K/V projection: single MXU matmul with N = 3D.
    qkv = jnp.dot(x2, wqkv_ref[...], preferred_element_type=jnp.float32)  # (rows, 3D) f32
    qkv = qkv.reshape(Bt, S, 3 * D)

    scale = 1.0 / np.sqrt(float(head_dim))

    # Static unroll over heads (n_heads is small).  Each head's output lands in a
    # static lane slice of the VMEM scratch accumulator instead of a concatenate.
    # TODO(synk): for large S, tile KV flash-style (running max/sum) so the (S,S)
    #             score buffers stay within v7x's 64 MiB VMEM.
    for h in range(n_heads):
        lo = h * head_dim
        hi = lo + head_dim
        qh = qkv[:, :, lo:hi].astype(jnp.bfloat16)                # (Bt, S, hd)
        kh = qkv[:, :, D + lo:D + hi].astype(jnp.bfloat16)        # (Bt, S, hd)
        vh = qkv[:, :, 2 * D + lo:2 * D + hi].astype(jnp.bfloat16)

        # K-transpose-free batched score matmul; scores + softmax in f32.
        s = jnp.einsum("bqd,bkd->bqk", qh, kh,
                       preferred_element_type=jnp.float32) * scale      # (Bt, S, S)
        m = jnp.max(s, axis=-1, keepdims=True)
        p = jnp.exp(s - m)
        p = p * pl.reciprocal(jnp.sum(p, axis=-1, keepdims=True), approx=True)

        oh = jnp.einsum("bqk,bkd->bqd", p.astype(jnp.bfloat16), vh,
                        preferred_element_type=jnp.float32)             # (Bt, S, hd)
        attn_ref[:, lo:hi] = oh.reshape(rows, head_dim)

    # Output projection over all heads at once (single matmul) + bias.
    out = jnp.dot(attn_ref[...].astype(jnp.bfloat16), wo_ref[...],
                  preferred_element_type=jnp.float32) + bo_ref[...]     # (rows, D)
    o_ref[...] = out.reshape(Bt, S, D).astype(o_ref.dtype)


def _pick_batch_tile(B: int, S: int, target_rows: int = 256, max_rows: int = 4096) -> int:
    """Smallest divisor of B whose Bt*S reaches ~target_rows (caps at max_rows)."""
    best = 1
    for cand in range(1, B + 1):
        if B % cand:
            continue
        if cand * S > max_rows:
            break
        best = cand
        if cand * S >= target_rows:
            break
    return best


def attention_pallas(x, wq, wk, wv, wo, bo, *, n_heads: int):
    """x: (B, S, D) float32.  Weights in nn.Linear layout.  Returns (B, S, D) f32."""
    B, S, D = x.shape
    assert D % n_heads == 0
    head_dim = D // n_heads

    # Pre-transpose once (nn.Linear does y = x @ W.T) and fuse Q/K/V so the kernel
    # does a single x @ Wqkv with no in-kernel transposes.  MXU operands in bf16.
    wqkv_t = jnp.concatenate([wq.T, wk.T, wv.T], axis=1).astype(jnp.bfloat16)  # (D, 3D)
    wo_t = wo.T.astype(jnp.bfloat16)                                           # (D, D)
    bo2 = bo.reshape(1, D).astype(jnp.float32)

    Bt = _pick_batch_tile(B, S)
    kernel = functools.partial(_attention_kernel, n_heads=n_heads, head_dim=head_dim)

    return pl.pallas_call(
        kernel,
        out_shape=jax.ShapeDtypeStruct((B, S, D), jnp.float32),
        grid_spec=pltpu.PrefetchScalarGridSpec(
            num_scalar_prefetch=0,
            grid=(B // Bt,),
            in_specs=[
                pl.BlockSpec((Bt, S, D), lambda b: (b, 0, 0)),    # x
                pl.BlockSpec((D, 3 * D), lambda b: (0, 0)),       # fused Wqkv (pre-T)
                pl.BlockSpec((D, D), lambda b: (0, 0)),           # Wo (pre-T)
                pl.BlockSpec((1, D), lambda b: (0, 0)),           # bo
            ],
            out_specs=pl.BlockSpec((Bt, S, D), lambda b: (b, 0, 0)),
            scratch_shapes=[pltpu.VMEM((Bt * S, D), jnp.float32)],
        ),
        compiler_params=pltpu.CompilerParams(
            dimension_semantics=("parallel",),
            vmem_limit_bytes=32 * 1024 * 1024,
        ),
    )(x, wqkv_t, wo_t, bo2)


def attention_reference(x, wq, wk, wv, wo, bo, *, n_heads: int):
    """Pure-JAX f32 reference mirroring the PyTorch forward (dropout = identity)."""
    B, S, D = x.shape
    hd = D // n_heads

    def proj(w):
        y = x @ w.T
        return y.reshape(B, S, n_heads, hd).transpose(0, 2, 1, 3)  # (B, H, S, hd)

    q, k, v = proj(wq), proj(wk), proj(wv)
    attn = jnp.einsum("bhqd,bhkd->bhqk", q, k) / np.sqrt(hd)
    attn = jax.nn.softmax(attn, axis=-1)
    out = jnp.einsum("bhqk,bhkd->bhqd", attn, v)
    out = out.transpose(0, 2, 1, 3).reshape(B, S, D)
    return out @ wo.T + bo


if __name__ == "__main__":
    # Small shapes consistent with the module's forward: x is (batch, seq, dim).
    B, S, D = 2, 8, 32
    n_heads = 4

    key = jax.random.PRNGKey(0)
    kx, kq, kk, kv, ko, kb = jax.random.split(key, 6)

    x = jax.random.normal(kx, (B, S, D), dtype=jnp.float32)
    # nn.Linear(dim, dim) weight shapes: (D_out, D_in) = (D, D).
    wq = jax.random.normal(kq, (D, D), dtype=jnp.float32) * 0.1
    wk = jax.random.normal(kk, (D, D), dtype=jnp.float32) * 0.1
    wv = jax.random.normal(kv, (D, D), dtype=jnp.float32) * 0.1
    wo = jax.random.normal(ko, (D, D), dtype=jnp.float32) * 0.1
    bo = jax.random.normal(kb, (D,), dtype=jnp.float32) * 0.1

    out = attention_pallas(x, wq, wk, wv, wo, bo, n_heads=n_heads)
    out = jax.block_until_ready(out)

    ref = attention_reference(x, wq, wk, wv, wo, bo, n_heads=n_heads)
    # bf16 MXU operands + approx reciprocal -> loosened tolerance (review-approved).
    np.testing.assert_allclose(np.asarray(out), np.asarray(ref), rtol=2e-2, atol=2e-2)

    print("KERNEL_OK")
</pallas_src>

<mosaic_0001>
module attributes {stable_mosaic.version = 11 : i64} {
  func.func @_attention_kernel(%arg0: i32, %arg1: memref<2x8x32xf32, #tpu.memory_space<vmem>>, %arg2: memref<32x96xbf16, #tpu.memory_space<vmem>>, %arg3: memref<32x32xbf16, #tpu.memory_space<vmem>>, %arg4: memref<1x32xf32, #tpu.memory_space<vmem>>, %arg5: memref<2x8x32xf32, #tpu.memory_space<vmem>>, %arg6: memref<16x32xf32, #tpu.memory_space<vmem>>) attributes {dimension_semantics = [#tpu.dimension_semantics<parallel>], iteration_bounds = array<i64: 1>, scalar_prefetch = 0 : i64, scratch_operands = 1 : i64, tpu.core_type = #tpu.core_type<tc>, window_params = [{transform_indices = @transform_0, window_bounds = array<i64: 2, 8, 32>}, {pipeline_mode = #tpu.pipeline_mode<synchronous>, transform_indices = @transform_1, window_bounds = array<i64: 32, 96>}, {pipeline_mode = #tpu.pipeline_mode<synchronous>, transform_indices = @transform_2, window_bounds = array<i64: 32, 32>}, {pipeline_mode = #tpu.pipeline_mode<synchronous>, transform_indices = @transform_3, window_bounds = array<i64: 1, 32>}, {transform_indices = @transform_4, window_bounds = array<i64: 2, 8, 32>}]} {
    %c0 = arith.constant 0 : index
    %c0_0 = arith.constant 0 : index
    %c0_1 = arith.constant 0 : index
    %0 = vector.load %arg1[%c0, %c0_0, %c0_1] : memref<2x8x32xf32, #tpu.memory_space<vmem>>, vector<2x8x32xf32>
    %1 = vector.shape_cast %0 : vector<2x8x32xf32> to vector<16x32xf32>
    %2 = arith.truncf %1 : vector<16x32xf32> to vector<16x32xbf16>
    %c0_2 = arith.constant 0 : index
    %c0_3 = arith.constant 0 : index
    %3 = vector.load %arg2[%c0_2, %c0_3] : memref<32x96xbf16, #tpu.memory_space<vmem>>, vector<32x96xbf16>
    %cst = arith.constant dense<0.000000e+00> : vector<16x96xf32>
    %4 = tpu.matmul %2, %3, %cst {dimension_numbers = #tpu.dot_dimension_numbers<[1], [0], [0], [1], [0, 0, 1, 1], [], []>} : vector<16x32xbf16>, vector<32x96xbf16>, vector<16x96xf32> -> vector<16x96xf32>
    %5 = vector.shape_cast %4 : vector<16x96xf32> to vector<2x8x96xf32>
    %6 = vector.extract_strided_slice %5 {offsets = [0, 0, 0], sizes = [2, 8, 8], strides = [1, 1, 1]} : vector<2x8x96xf32> to vector<2x8x8xf32>
    %7 = arith.truncf %6 : vector<2x8x8xf32> to vector<2x8x8xbf16>
    %8 = vector.extract_strided_slice %5 {offsets = [0, 0, 32], sizes = [2, 8, 8], strides = [1, 1, 1]} : vector<2x8x96xf32> to vector<2x8x8xf32>
    %9 = arith.truncf %8 : vector<2x8x8xf32> to vector<2x8x8xbf16>
    %10 = vector.extract_strided_slice %5 {offsets = [0, 0, 64], sizes = [2, 8, 8], strides = [1, 1, 1]} : vector<2x8x96xf32> to vector<2x8x8xf32>
    %11 = arith.truncf %10 : vector<2x8x8xf32> to vector<2x8x8xbf16>
    "tpu.trace_start"() <{level = 10 : i32, message = "bqd,bkd->bqk"}> : () -> ()
    %cst_4 = arith.constant dense<0.000000e+00> : vector<2x8x8xf32>
    %12 = tpu.matmul %7, %9, %cst_4 {dimension_numbers = #tpu.dot_dimension_numbers<[2], [2], [1], [1], [0, 0, 0, 1, 1, 1], [0], [0]>} : vector<2x8x8xbf16>, vector<2x8x8xbf16>, vector<2x8x8xf32> -> vector<2x8x8xf32>
    "tpu.trace_stop"() : () -> ()
    %cst_5 = arith.constant 0.353553385 : f32
    %13 = vector.broadcast %cst_5 : f32 to vector<2x8x8xf32>
    %14 = arith.mulf %12, %13 : vector<2x8x8xf32>
    %cst_6 = arith.constant dense<0xFF800000> : vector<2x8xf32>
    %15 = vector.multi_reduction <maximumf>, %14, %cst_6 [2] : vector<2x8x8xf32> to vector<2x8xf32>
    %16 = vector.shape_cast %15 : vector<2x8xf32> to vector<2x8x1xf32>
    %17 = vector.broadcast %16 : vector<2x8x1xf32> to vector<2x8x8xf32>
    %18 = arith.subf %14, %17 : vector<2x8x8xf32>
    %19 = math.exp %18 : vector<2x8x8xf32>
    %cst_7 = arith.constant dense<0.000000e+00> : vector<2x8xf32>
    %20 = vector.multi_reduction <add>, %19, %cst_7 [2] : vector<2x8x8xf32> to vector<2x8xf32>
    %21 = vector.shape_cast %20 : vector<2x8xf32> to vector<2x8x1xf32>
    %22 = tpu.reciprocal %21 {approx = true} : vector<2x8x1xf32> -> vector<2x8x1xf32>
    %23 = vector.broadcast %22 : vector<2x8x1xf32> to vector<2x8x8xf32>
    %24 = arith.mulf %19, %23 : vector<2x8x8xf32>
    %25 = arith.truncf %24 : vector<2x8x8xf32> to vector<2x8x8xbf16>
    "tpu.trace_start"() <{level = 10 : i32, message = "bqk,bkd->bqd"}> : () -> ()
    %cst_8 = arith.constant dense<0.000000e+00> : vector<2x8x8xf32>
    %26 = tpu.matmul %25, %11, %cst_8 {dimension_numbers = #tpu.dot_dimension_numbers<[2], [1], [1], [2], [0, 0, 0, 1, 1, 2], [0], [0]>} : vector<2x8x8xbf16>, vector<2x8x8xbf16>, vector<2x8x8xf32> -> vector<2x8x8xf32>
    "tpu.trace_stop"() : () -> ()
    %27 = vector.shape_cast %26 : vector<2x8x8xf32> to vector<16x8xf32>
    %c0_9 = arith.constant 0 : index
    %c0_10 = arith.constant 0 : index
    %28 = vector.load %arg6[%c0_9, %c0_10] : memref<16x32xf32, #tpu.memory_space<vmem>>, vector<16x8xf32>
    tpu.vector_store %arg6[%c0_9, %c0_10], %27 {strides = array<i32>} : memref<16x32xf32, #tpu.memory_space<vmem>>, vector<16x8xf32>,
    %29 = vector.extract_strided_slice %5 {offsets = [0, 0, 8], sizes = [2, 8, 8], strides = [1, 1, 1]} : vector<2x8x96xf32> to vector<2x8x8xf32>
    %30 = arith.truncf %29 : vector<2x8x8xf32> to vector<2x8x8xbf16>
    %31 = vector.extract_strided_slice %5 {offsets = [0, 0, 40], sizes = [2, 8, 8], strides = [1, 1, 1]} : vector<2x8x96xf32> to vector<2x8x8xf32>
    %32 = arith.truncf %31 : vector<2x8x8xf32> to vector<2x8x8xbf16>
    %33 = vector.extract_strided_slice %5 {offsets = [0, 0, 72], sizes = [2, 8, 8], strides = [1, 1, 1]} : vector<2x8x96xf32> to vector<2x8x8xf32>
    %34 = arith.truncf %33 : vector<2x8x8xf32> to vector<2x8x8xbf16>
    "tpu.trace_start"() <{level = 10 : i32, message = "bqd,bkd->bqk"}> : () -> ()
    %cst_11 = arith.constant dense<0.000000e+00> : vector<2x8x8xf32>
    %35 = tpu.matmul %30, %32, %cst_11 {dimension_numbers = #tpu.dot_dimension_numbers<[2], [2], [1], [1], [0, 0, 0, 1, 1, 1], [0], [0]>} : vector<2x8x8xbf16>, vector<2x8x8xbf16>, vector<2x8x8xf32> -> vector<2x8x8xf32>
    "tpu.trace_stop"() : () -> ()
    %cst_12 = arith.constant 0.353553385 : f32
    %36 = vector.broadcast %cst_12 : f32 to vector<2x8x8xf32>
    %37 = arith.mulf %35, %36 : vector<2x8x8xf32>
    %cst_13 = arith.constant dense<0xFF800000> : vector<2x8xf32>
    %38 = vector.multi_reduction <maximumf>, %37, %cst_13 [2] : vector<2x8x8xf32> to vector<2x8xf32>
    %39 = vector.shape_cast %38 : vector<2x8xf32> to vector<2x8x1xf32>
    %40 = vector.broadcast %39 : vector<2x8x1xf32> to vector<2x8x8xf32>
    %41 = arith.subf %37, %40 : vector<2x8x8xf32>
    %42 = math.exp %41 : vector<2x8x8xf32>
    %cst_14 = arith.constant dense<0.000000e+00> : vector<2x8xf32>
    %43 = vector.multi_reduction <add>, %42, %cst_14 [2] : vector<2x8x8xf32> to vector<2x8xf32>
    %44 = vector.shape_cast %43 : vector<2x8xf32> to vector<2x8x1xf32>
    %45 = tpu.reciprocal %44 {approx = true} : vector<2x8x1xf32> -> vector<2x8x1xf32>
    %46 = vector.broadcast %45 : vector<2x8x1xf32> to vector<2x8x8xf32>
    %47 = arith.mulf %42, %46 : vector<2x8x8xf32>
    %48 = arith.truncf %47 : vector<2x8x8xf32> to vector<2x8x8xbf16>
    "tpu.trace_start"() <{level = 10 : i32, message = "bqk,bkd->bqd"}> : () -> ()
    %cst_15 = arith.constant dense<0.000000e+00> : vector<2x8x8xf32>
    %49 = tpu.matmul %48, %34, %cst_15 {dimension_numbers = #tpu.dot_dimension_numbers<[2], [1], [1], [2], [0, 0, 0, 1, 1, 2], [0], [0]>} : vector<2x8x8xbf16>, vector<2x8x8xbf16>, vector<2x8x8xf32> -> vector<2x8x8xf32>
    "tpu.trace_stop"() : () -> ()
    %50 = vector.shape_cast %49 : vector<2x8x8xf32> to vector<16x8xf32>
    %c0_16 = arith.constant 0 : index
    %c8 = arith.constant 8 : index
    %51 = vector.load %arg6[%c0_16, %c8] : memref<16x32xf32, #tpu.memory_space<vmem>>, vector<16x8xf32>
    tpu.vector_store %arg6[%c0_16, %c8], %50 {strides = array<i32>} : memref<16x32xf32, #tpu.memory_space<vmem>>, vector<16x8xf32>,
    %52 = vector.extract_strided_slice %5 {offsets = [0, 0, 16], sizes = [2, 8, 8], strides = [1, 1, 1]} : vector<2x8x96xf32> to vector<2x8x8xf32>
    %53 = arith.truncf %52 : vector<2x8x8xf32> to vector<2x8x8xbf16>
    %54 = vector.extract_strided_slice %5 {offsets = [0, 0, 48], sizes = [2, 8, 8], strides = [1, 1, 1]} : vector<2x8x96xf32> to vector<2x8x8xf32>
    %55 = arith.truncf %54 : vector<2x8x8xf32> to vector<2x8x8xbf16>
    %56 = vector.extract_strided_slice %5 {offsets = [0, 0, 80], sizes = [2, 8, 8], strides = [1, 1, 1]} : vector<2x8x96xf32> to vector<2x8x8xf32>
    %57 = arith.truncf %56 : vector<2x8x8xf32> to vector<2x8x8xbf16>
    "tpu.trace_start"() <{level = 10 : i32, message = "bqd,bkd->bqk"}> : () -> ()
    %cst_17 = arith.constant dense<0.000000e+00> : vector<2x8x8xf32>
    %58 = tpu.matmul %53, %55, %cst_17 {dimension_numbers = #tpu.dot_dimension_numbers<[2], [2], [1], [1], [0, 0, 0, 1, 1, 1], [0], [0]>} : vector<2x8x8xbf16>, vector<2x8x8xbf16>, vector<2x8x8xf32> -> vector<2x8x8xf32>
    "tpu.trace_stop"() : () -> ()
    %cst_18 = arith.constant 0.353553385 : f32
    %59 = vector.broadcast %cst_18 : f32 to vector<2x8x8xf32>
    %60 = arith.mulf %58, %59 : vector<2x8x8xf32>
    %cst_19 = arith.constant dense<0xFF800000> : vector<2x8xf32>
    %61 = vector.multi_reduction <maximumf>, %60, %cst_19 [2] : vector<2x8x8xf32> to vector<2x8xf32>
    %62 = vector.shape_cast %61 : vector<2x8xf32> to vector<2x8x1xf32>
    %63 = vector.broadcast %62 : vector<2x8x1xf32> to vector<2x8x8xf32>
    %64 = arith.subf %60, %63 : vector<2x8x8xf32>
    %65 = math.exp %64 : vector<2x8x8xf32>
    %cst_20 = arith.constant dense<0.000000e+00> : vector<2x8xf32>
    %66 = vector.multi_reduction <add>, %65, %cst_20 [2] : vector<2x8x8xf32> to vector<2x8xf32>
    %67 = vector.shape_cast %66 : vector<2x8xf32> to vector<2x8x1xf32>
    %68 = tpu.reciprocal %67 {approx = true} : vector<2x8x1xf32> -> vector<2x8x1xf32>
    %69 = vector.broadcast %68 : vector<2x8x1xf32> to vector<2x8x8xf32>
    %70 = arith.mulf %65, %69 : vector<2x8x8xf32>
    %71 = arith.truncf %70 : vector<2x8x8xf32> to vector<2x8x8xbf16>
    "tpu.trace_start"() <{level = 10 : i32, message = "bqk,bkd->bqd"}> : () -> ()
    %cst_21 = arith.constant dense<0.000000e+00> : vector<2x8x8xf32>
    %72 = tpu.matmul %71, %57, %cst_21 {dimension_numbers = #tpu.dot_dimension_numbers<[2], [1], [1], [2], [0, 0, 0, 1, 1, 2], [0], [0]>} : vector<2x8x8xbf16>, vector<2x8x8xbf16>, vector<2x8x8xf32> -> vector<2x8x8xf32>
    "tpu.trace_stop"() : () -> ()
    %73 = vector.shape_cast %72 : vector<2x8x8xf32> to vector<16x8xf32>
    %c0_22 = arith.constant 0 : index
    %c16 = arith.constant 16 : index
    %74 = vector.load %arg6[%c0_22, %c16] : memref<16x32xf32, #tpu.memory_space<vmem>>, vector<16x8xf32>
    tpu.vector_store %arg6[%c0_22, %c16], %73 {strides = array<i32>} : memref<16x32xf32, #tpu.memory_space<vmem>>, vector<16x8xf32>,
    %75 = vector.extract_strided_slice %5 {offsets = [0, 0, 24], sizes = [2, 8, 8], strides = [1, 1, 1]} : vector<2x8x96xf32> to vector<2x8x8xf32>
    %76 = arith.truncf %75 : vector<2x8x8xf32> to vector<2x8x8xbf16>
    %77 = vector.extract_strided_slice %5 {offsets = [0, 0, 56], sizes = [2, 8, 8], strides = [1, 1, 1]} : vector<2x8x96xf32> to vector<2x8x8xf32>
    %78 = arith.truncf %77 : vector<2x8x8xf32> to vector<2x8x8xbf16>
    %79 = vector.extract_strided_slice %5 {offsets = [0, 0, 88], sizes = [2, 8, 8], strides = [1, 1, 1]} : vector<2x8x96xf32> to vector<2x8x8xf32>
    %80 = arith.truncf %79 : vector<2x8x8xf32> to vector<2x8x8xbf16>
    "tpu.trace_start"() <{level = 10 : i32, message = "bqd,bkd->bqk"}> : () -> ()
    %cst_23 = arith.constant dense<0.000000e+00> : vector<2x8x8xf32>
    %81 = tpu.matmul %76, %78, %cst_23 {dimension_numbers = #tpu.dot_dimension_numbers<[2], [2], [1], [1], [0, 0, 0, 1, 1, 1], [0], [0]>} : vector<2x8x8xbf16>, vector<2x8x8xbf16>, vector<2x8x8xf32> -> vector<2x8x8xf32>
    "tpu.trace_stop"() : () -> ()
    %cst_24 = arith.constant 0.353553385 : f32
    %82 = vector.broadcast %cst_24 : f32 to vector<2x8x8xf32>
    %83 = arith.mulf %81, %82 : vector<2x8x8xf32>
    %cst_25 = arith.constant dense<0xFF800000> : vector<2x8xf32>
    %84 = vector.multi_reduction <maximumf>, %83, %cst_25 [2] : vector<2x8x8xf32> to vector<2x8xf32>
    %85 = vector.shape_cast %84 : vector<2x8xf32> to vector<2x8x1xf32>
    %86 = vector.broadcast %85 : vector<2x8x1xf32> to vector<2x8x8xf32>
    %87 = arith.subf %83, %86 : vector<2x8x8xf32>
    %88 = math.exp %87 : vector<2x8x8xf32>
    %cst_26 = arith.constant dense<0.000000e+00> : vector<2x8xf32>
    %89 = vector.multi_reduction <add>, %88, %cst_26 [2] : vector<2x8x8xf32> to vector<2x8xf32>
    %90 = vector.shape_cast %89 : vector<2x8xf32> to vector<2x8x1xf32>
    %91 = tpu.reciprocal %90 {approx = true} : vector<2x8x1xf32> -> vector<2x8x1xf32>
    %92 = vector.broadcast %91 : vector<2x8x1xf32> to vector<2x8x8xf32>
    %93 = arith.mulf %88, %92 : vector<2x8x8xf32>
    %94 = arith.truncf %93 : vector<2x8x8xf32> to vector<2x8x8xbf16>
    "tpu.trace_start"() <{level = 10 : i32, message = "bqk,bkd->bqd"}> : () -> ()
    %cst_27 = arith.constant dense<0.000000e+00> : vector<2x8x8xf32>
    %95 = tpu.matmul %94, %80, %cst_27 {dimension_numbers = #tpu.dot_dimension_numbers<[2], [1], [1], [2], [0, 0, 0, 1, 1, 2], [0], [0]>} : vector<2x8x8xbf16>, vector<2x8x8xbf16>, vector<2x8x8xf32> -> vector<2x8x8xf32>
    "tpu.trace_stop"() : () -> ()
    %96 = vector.shape_cast %95 : vector<2x8x8xf32> to vector<16x8xf32>
    %c0_28 = arith.constant 0 : index
    %c24 = arith.constant 24 : index
    %97 = vector.load %arg6[%c0_28, %c24] : memref<16x32xf32, #tpu.memory_space<vmem>>, vector<16x8xf32>
    tpu.vector_store %arg6[%c0_28, %c24], %96 {strides = array<i32>} : memref<16x32xf32, #tpu.memory_space<vmem>>, vector<16x8xf32>,
    %c0_29 = arith.constant 0 : index
    %c0_30 = arith.constant 0 : index
    %98 = vector.load %arg6[%c0_29, %c0_30] : memref<16x32xf32, #tpu.memory_space<vmem>>, vector<16x32xf32>
    %99 = arith.truncf %98 : vector<16x32xf32> to vector<16x32xbf16>
    %c0_31 = arith.constant 0 : index
    %c0_32 = arith.constant 0 : index
    %100 = vector.load %arg3[%c0_31, %c0_32] : memref<32x32xbf16, #tpu.memory_space<vmem>>, vector<32x32xbf16>
    %cst_33 = arith.constant dense<0.000000e+00> : vector<16x32xf32>
    %101 = tpu.matmul %99, %100, %cst_33 {dimension_numbers = #tpu.dot_dimension_numbers<[1], [0], [0], [1], [0, 0, 1, 1], [], []>} : vector<16x32xbf16>, vector<32x32xbf16>, vector<16x32xf32> -> vector<16x32xf32>
    %c0_34 = arith.constant 0 : index
    %c0_35 = arith.constant 0 : index
    %102 = vector.load %arg4[%c0_34, %c0_35] : memref<1x32xf32, #tpu.memory_space<vmem>>, vector<1x32xf32>
    %103 = vector.broadcast %102 : vector<1x32xf32> to vector<16x32xf32>
    %104 = arith.addf %101, %103 : vector<16x32xf32>
    %105 = vector.shape_cast %104 : vector<16x32xf32> to vector<2x8x32xf32>
    %c0_36 = arith.constant 0 : index
    %c0_37 = arith.constant 0 : index
    %c0_38 = arith.constant 0 : index
    %106 = vector.load %arg5[%c0_36, %c0_37, %c0_38] : memref<2x8x32xf32, #tpu.memory_space<vmem>>, vector<2x8x32xf32>
    tpu.vector_store %arg5[%c0_36, %c0_37, %c0_38], %105 {strides = array<i32>} : memref<2x8x32xf32, #tpu.memory_space<vmem>>, vector<2x8x32xf32>,
    return
  }
  func.func @transform_0(%arg0: i32) -> (i32, i32, i32) {
    %c0_i32 = arith.constant 0 : i32
    %c0_i32_0 = arith.constant 0 : i32
    %c0_i32_1 = arith.constant 0 : i32
    return %arg0, %c0_i32, %c0_i32_0 : i32, i32, i32
  }
  func.func @transform_1(%arg0: i32) -> (i32, i32) {
    %c0_i32 = arith.constant 0 : i32
    %c0_i32_0 = arith.constant 0 : i32
    %c0_i32_1 = arith.constant 0 : i32
    return %c0_i32, %c0_i32_0 : i32, i32
  }
  func.func @transform_2(%arg0: i32) -> (i32, i32) {
    %c0_i32 = arith.constant 0 : i32
    %c0_i32_0 = arith.constant 0 : i32
    %c0_i32_1 = arith.constant 0 : i32
    return %c0_i32, %c0_i32_0 : i32, i32
  }
  func.func @transform_3(%arg0: i32) -> (i32, i32) {
    %c0_i32 = arith.constant 0 : i32
    %c0_i32_0 = arith.constant 0 : i32
    %c0_i32_1 = arith.constant 0 : i32
    return %c0_i32, %c0_i32_0 : i32, i32
  }
  func.func @transform_4(%arg0: i32) -> (i32, i32, i32) {
    %c0_i32 = arith.constant 0 : i32
    %c0_i32_0 = arith.constant 0 : i32
    %c0_i32_1 = arith.constant 0 : i32
    return %arg0, %c0_i32, %c0_i32_0 : i32, i32, i32
  }
}

</mosaic_0001>

<bundles_post_ra>
// kernel: tpu_custom_call.1
= control target key start
LH: loop header
LB: loop body
LE: loop exit
PB: predicated region body
PF: predicated region fallthrough
CT: control target
= control target key end

     0   :  { %9 = vsyncpa [#allocation4], 0  ;;  %s1029_s0 = inlined_call_operand.hbm [shape: f32[2,8,32], index: 0, kind: input, shape index: {}]   ;;  %s1030_s1 = inlined_call_operand.hbm [shape: bf16[32,96], index: 1, kind: input, shape index: {}]   ;;  %s1031_s2 = inlined_call_operand.hbm [shape: bf16[32,32], index: 2, kind: input, shape index: {}]   ;;  %s1032_s3 = inlined_call_operand.vmem [shape: f32[1,32], index: 3, kind: input, shape index: {}]   ;;  %s1033_s4 = inlined_call_operand.hbm [shape: f32[2,8,32], index: 4, kind: output, shape index: {}]  }
   0x1   :  { %10 = vsyncpa [#allocation7], 0  ;;  %s29_s17 = sshll.u32 %s1030_s1, 4  ;;  %s30_s17 = int_to_ptr.hbm [resolvable:$true] %s29_s17 }
   0x2   :  { %11 = vsyncpa [#allocation5], 0  ;;  %s855_s18 = smov [#allocation6]   ;;  %s16_s22 = sshll.u32 %s1029_s0, 4  ;;  %s17_s22 = int_to_ptr.hbm [resolvable:$true] %s16_s22 }
   0x3   :  { %s31_s19 = sshll.u32 %s855_s18, 4  ;;  %s856_s23 = smov 64   ;;  %s32_s19 = int_to_ptr.vmem [resolvable:$true] %s31_s19 }
   0x4   :  { %s857_s24 = smov 4   ;;  %s858_s25 = smov [#allocation3]  }
   0x5   :  { %37 = dma.hbm_to_vmem [thread:$0]  %s30_s17, 256, %s32_s19, [#allocation7], %s856_s23, %s856_s23, %s857_s24  }
   0x6   :  { %s18_s26 = sshll.u32 %s858_s25, 4  ;;  %s859_s27 = smov 128   ;;  %s19_s26 = int_to_ptr.vmem [resolvable:$true] %s18_s26 }
   0x7   :  { %s860_s1 = smov 8   ;;  %s42_s30 = sshll.u32 %s1031_s2, 4  ;;  %s43_s30 = int_to_ptr.hbm [resolvable:$true] %s42_s30 }
   0x8   :  { %24 = dma.hbm_to_vmem [thread:$0]  %s17_s22, 256, %s19_s26, [#allocation4], %s859_s27, %s859_s27, %s860_s1  }
   0x9   :  { %s861_s0 = smov [#allocation8]  }
   0xa   :  { %s44_s5 = sshll.u32 %s861_s0, 4  ;;  %s45_s5 = int_to_ptr.vmem [resolvable:$true] %s44_s5 }
   0xb   :  { %50 = dma.hbm_to_vmem [thread:$0]  %s43_s30, 256, %s45_s5, [#allocation7], %s856_s23, %s856_s23, %s857_s24  }
   0xc   :  { %849 = dma.done.wait [#allocation4], 256  }
   0xd   :  { %850 = vsyncadd [#allocation4], 4294967040 }
   0xe   :  { %851 = dma.done.wait [#allocation7], 512  }
   0xf   :  { %852 = vsyncadd [#allocation7], 4294966784  ;;  %v697_v0 = vld [vmem:[#allocation6 + $0x8] sm:$0xff]  ;;  %v696_v1 = vld [vmem:[#allocation6] sm:$0xff]  ;;  %vm85_vm0 = vcmask 261120   ;;  %s862_s2 = smov 120  }
  0x10   :  { %95 = vmatpush.bf16.msra.mxu0 %v697_v0  ;;  %v66_v2 = vld [vmem:[#allocation3] sm:$0xff]  ;;  %v67_v3 = vld [vmem:[#allocation3 + $0x8] sm:$0xff]  ;;  %s863_s6 = smov 88   ;;  %s864_s7 = smov 96   ;;  %vm110_vm1 = vcmask 64512   ;;  %vm185_vm2 = vcmask 1043456  }
  0x11   :  { %v68_v4 = vpack.c.bf16 %v67_v3, %v66_v2  ;;  %s865_s8 = smov 112   ;;  %s866_s9 = smov 80   ;;  %vm347_vm3 = vcmask 130112   ;;  %vm472_vm4 = vcmask 195712   ;;  %vm597_vm5 = vcmask 261312  }
  0x12   :  { %s867_s10 = smov 72   ;;  %s868_s11 = smov 104  }
  0x13   :  { %s869_s12 = smov 56   ;;  %s870_s13 = smov 48  }
  0x14   :  { %96 = vmatpush.bf16.msra.mxu0 %v696_v1  ;;  %s871_s14 = smov 40   ;;  %s872_s15 = smov 16  }
  0x15   :  { %s873_s16 = smov 24   ;;  %s874_s19 = smov [#allocation9]  }
  0x16   :  { %s646_s20 = sshll.u32 %s874_s19, 4  ;;  %s647_s20 = int_to_ptr.vmem [resolvable:$true] %s646_s20 }
  0x17   :  { %670 = vmatmul.msk.bf16.vlgmr.msra.gmra.mxu0 %vm85_vm0, %v68_v4 }
  0x94   :  { %v98_v5 = vpop.f32.mrf.mxu0 }
  0x95   :  { %v103_v6 = vpack.c.bf16 %v98_v5, %v98_v5 }
  0x97   :  { %v106_v7 = vunpack.c.l.b16 %v103_v6 }
  0x99   :  { %v917_v8 = vpack.c.b16 %v106_v7, %v106_v7 }
  0x9b   :  { %225 = vrot.lane.b32.xlu2 %v917_v8, %s862_s2  ;;  %227 = vrot.lane.b32.xlu1 %v917_v8, %s863_s6 }
  0x9c   :  { %108 = vrot.lane.b32.xlu0 %v917_v8, %s864_s7  ;;  %v100_v9 = vpop.f32.mrf.mxu0 }
  0x9d   :  { %v104_v10 = vpack.c.bf16 %v100_v9, %v100_v9 }
  0x9f   :  { %v131_v11 = vunpack.c.l.b16 %v104_v10 }
  0xa1   :  { %v922_v12 = vpack.c.b16 %v131_v11, %v131_v11 }
  0xa3   :  { %248 = vrot.lane.b32.xlu2 %v922_v12, %s862_s2  ;;  %250 = vrot.lane.b32.xlu1 %v922_v12, %s863_s6 }
  0xa4   :  { %133 = vrot.lane.b32.xlu0 %v922_v12, %s864_s7 }
  0xab   :  { %350 = vrot.lane.b32.xlu2 %v917_v8, %s865_s8  ;;  %375 = vrot.lane.b32.xlu1 %v922_v12, %s866_s9 }
  0xac   :  { %352 = vrot.lane.b32.xlu0 %v917_v8, %s866_s9 }
  0xb3   :  { %500 = vrot.lane.b32.xlu2 %v922_v12, %s867_s10  ;;  %477 = vrot.lane.b32.xlu1 %v917_v8, %s867_s10 }
  0xb4   :  { %373 = vrot.lane.b32.xlu0 %v922_v12, %s865_s8 }
  0xbb   :  { %498 = vrot.lane.b32.xlu1 %v922_v12, %s868_s11 }
  0xbc   :  { %475 = vrot.lane.b32.xlu0 %v917_v8, %s868_s11 }
  0xf5   :  { %v226_v13 = vpop.permute.xlu2 %225 }
  0xfd   :  { %v249_v18 = vpop.permute.xlu2 %248 }
 0x105   :  { %v351_v23 = vpop.permute.xlu2 %350 }
 0x10d   :  { %v228_v14 = vpop.permute.xlu1 %227  ;;  %v501_v28 = vpop.permute.xlu2 %500 }
 0x10e   :  { %v109_v15 = vpop.permute.xlu0 %108  ;;  %v233_v16 = vsel %vm110_vm1, %v228_v14, 0  ;;  %v506_v31 = vsel %vm110_vm1, %v501_v28, 0 }
 0x10f   :  { %v115_v17 = vsel %vm110_vm1, %v109_v15, 0  ;;  %242 = vmatpush.bf16.xpose.msrb.mxu0 %v233_v16 }
 0x110   :  { %124 = vmatpush.bf16.xpose.msra.mxu1 %v115_v17 }
 0x115   :  { %v251_v19 = vpop.permute.xlu1 %250 }
 0x116   :  { %v134_v20 = vpop.permute.xlu0 %133  ;;  %675 = vmatmul.msk.bf16.vlgmr.msrb.gmra.mxu0 %vm110_vm1, %v226_v13  ;;  %v256_v21 = vsel %vm110_vm1, %v251_v19, 0 }
 0x117   :  { %671 = vmatmul.msk.bf16.vlgmr.msra.gmra.mxu1 %vm110_vm1, %v103_v6  ;;  %v139_v22 = vsel %vm110_vm1, %v134_v20, 0 }
 0x118   :  { %148 = vmatpush.bf16.xpose.msra.mxu2 %v139_v22  ;;  %265 = vmatpush.bf16.xpose.msrb.mxu1 %v256_v21 }
 0x11d   :  { %v376_v24 = vpop.permute.xlu1 %375 }
 0x11e   :  { %v381_v25 = vsel %vm110_vm1, %v376_v24, 0  ;;  %v353_v26 = vpop.permute.xlu0 %352 }
 0x11f   :  { %v358_v27 = vsel %vm110_vm1, %v353_v26, 0  ;;  %672 = vmatmul.msk.bf16.vlgmr.msra.gmra.mxu2 %vm110_vm1, %v104_v10 }
 0x120   :  { %390 = vmatpush.bf16.xpose.msra.mxu1 %v381_v25  ;;  %367 = vmatpush.bf16.xpose.msra.mxu0 %v358_v27 }
 0x125   :  { %v478_v29 = vpop.permute.xlu1 %477 }
 0x126   :  { %v483_v30 = vsel %vm110_vm1, %v478_v29, 0  ;;  %v374_v32 = vpop.permute.xlu0 %373 }
 0x127   :  { %676 = vmatmul.msk.bf16.vlgmr.msrb.gmra.mxu1 %vm110_vm1, %v249_v18  ;;  %679 = vmatmul.msk.bf16.vlgmr.msra.gmra.mxu0 %vm110_vm1, %v351_v23 }
 0x128   :  { %515 = vmatpush.bf16.xpose.msrb.mxu1 %v506_v31  ;;  %492 = vmatpush.bf16.xpose.msrb.mxu0 %v483_v30 }
 0x12d   :  { %v499_v34 = vpop.permute.xlu1 %498 }
 0x12e   :  { %v476_v33 = vpop.permute.xlu0 %475 }
 0x137   :  { %680 = vmatmul.msk.bf16.vlgmr.msra.gmra.mxu1 %vm110_vm1, %v374_v32  ;;  %683 = vmatmul.msk.bf16.vlgmr.msrb.gmra.mxu0 %vm110_vm1, %v476_v33 }
 0x147   :  { %684 = vmatmul.msk.bf16.vlgmr.msrb.gmra.mxu1 %vm110_vm1, %v499_v34 }
 0x193   :  { %v244_v35 = vpop.f32.mrf.mxu0 }
 0x194   :  { %v126_v36 = vpop.f32.mrf.mxu1  ;;  %v271_v37 = vmul.f32 0.35355338, %v244_v35 }
 0x195   :  { %v154_v38 = vmul.f32 0.35355338, %v126_v36 }
 0x196   :  { %v273_v39 = vsel %vm110_vm1, %v271_v37, -inf }
 0x197   :  { %v156_v40 = vsel %vm110_vm1, %v154_v38, -inf  ;;  %274 = vmax.xlane.f32.xlu1 %v273_v39 }
 0x198   :  { %157 = vmax.xlane.f32.xlu2 %v156_v40 }
 0x19b   :  { %v246_v41 = vpop.f32.mrf.mxu0 }
 0x19c   :  { %v128_v42 = vpop.f32.mrf.mxu1 }
 0x1a2   :  { %v150_v43 = vpop.f32.mrf.mxu2 }
 0x1a3   :  { %v155_v44 = vmul.f32 0.35355338, %v150_v43 }
 0x1a4   :  { %v267_v45 = vpop.f32.mrf.mxu1  ;;  %v369_v46 = vpop.f32.mrf.mxu0 }
 0x1a5   :  { %v272_v47 = vmul.f32 0.35355338, %v267_v45  ;;  %v159_v48 = vsel %vm110_vm1, %v155_v44, -inf  ;;  %v396_v63 = vmul.f32 0.35355338, %v369_v46 }
 0x1a6   :  { %160 = vmax.xlane.f32.xlu0 %v159_v48 }
 0x1a7   :  { %v276_v49 = vsel %vm110_vm1, %v272_v47, -inf  ;;  %v398_v1 = vsel %vm110_vm1, %v396_v63, -inf }
 0x1a8   :  { %277 = vmax.xlane.f32.xlu2 %v276_v49 }
 0x1aa   :  { %v152_v50 = vpop.f32.mrf.mxu2 }
 0x1ac   :  { %v269_v51 = vpop.f32.mrf.mxu1  ;;  %v371_v52 = vpop.f32.mrf.mxu0 }
 0x1b0   :  { %202 = vrot.lane.b32.xlu1 %v922_v12, %s856_s23 }
 0x1b4   :  { %v392_v53 = vpop.f32.mrf.mxu1  ;;  %v494_v54 = vpop.f32.mrf.mxu0 }
 0x1b5   :  { %v397_v60 = vmul.f32 0.35355338, %v392_v53  ;;  %v521_v0 = vmul.f32 0.35355338, %v494_v54 }
 0x1b7   :  { %v401_v62 = vsel %vm110_vm1, %v397_v60, -inf  ;;  %v523_v2 = vsel %vm110_vm1, %v521_v0, -inf }
 0x1b8   :  { %318 = vrot.lane.b32.xlu1 %v922_v12, %s869_s12 }
 0x1ba   :  { %297 = vrot.lane.b32.xlu0 %v917_v8, %s869_s12 }
 0x1bc   :  { %v394_v55 = vpop.f32.mrf.mxu1  ;;  %v496_v56 = vpop.f32.mrf.mxu0 }
 0x1c0   :  { %180 = vrot.lane.b32.xlu2 %v917_v8, %s856_s23  ;;  %s648_s23 = sshll.u32 %s1033_s4, 4  ;;  %s649_s23 = int_to_ptr.hbm [resolvable:$true] %s648_s23 }
 0x1c4   :  { %v517_v57 = vpop.f32.mrf.mxu1 }
 0x1c5   :  { %v522_v59 = vmul.f32 0.35355338, %v517_v57 }
 0x1c7   :  { %v526_v61 = vsel %vm110_vm1, %v522_v59, -inf }
 0x1cc   :  { %v519_v58 = vpop.f32.mrf.mxu1 }
 0x1e2   :  { %527 = vmax.xlane.f32.xlu1 %v526_v61 }
 0x1e4   :  { %402 = vmax.xlane.f32.xlu0 %v401_v62 }
 0x1e9   :  { %399 = vmax.xlane.f32.xlu2 %v398_v1 }
 0x1ec   :  { %524 = vmax.xlane.f32.xlu0 %v523_v2 }
 0x20a   :  { %v275_v3 = vpop.xlane.xlu1 %274 }
 0x20b   :  { %v158_v4 = vpop.xlane.xlu2 %157  ;;  %v279_v5 = vsub.f32 %v271_v37, %v275_v3 }
 0x20c   :  { %v162_v6 = vsub.f32 %v154_v38, %v158_v4 }
 0x20d   :  { %v281_v7 = vmul.f32 1.442695, %v279_v5 }
 0x20e   :  { %v164_v9 = vmul.f32 1.442695, %v162_v6 }
 0x20f   :  { %721 = vpow2.f32 %v281_v7 }
 0x210   :  { %723 = vpow2.f32 %v164_v9 }
 0x215   :  { %v965_v10 = vpop.eup %721 }
 0x216   :  { %v967_v11 = vpop.eup %723  ;;  %v285_v13 = vsel %vm110_vm1, %v965_v10, 0.0 }
 0x217   :  { %v168_v14 = vsel %vm110_vm1, %v967_v11, 0.0  ;;  %286 = vadd.xlane.f32.xlu0 %v285_v13 }
 0x218   :  { %169 = vadd.xlane.f32.xlu1 %v168_v14 }
 0x219   :  { %v161_v15 = vpop.xlane.xlu0 %160 }
 0x21a   :  { %v163_v16 = vsub.f32 %v155_v44, %v161_v15 }
 0x21b   :  { %v278_v17 = vpop.xlane.xlu2 %277 }
 0x21c   :  { %v166_v18 = vmul.f32 1.442695, %v163_v16  ;;  %v280_v19 = vsub.f32 %v272_v47, %v278_v17 }
 0x21e   :  { %725 = vpow2.f32 %v166_v18  ;;  %v283_v20 = vmul.f32 1.442695, %v280_v19 }
 0x220   :  { %727 = vpow2.f32 %v283_v20 }
 0x222   :  { %v203_v21 = vpop.permute.xlu1 %202 }
 0x223   :  { %v181_v22 = vpop.permute.xlu2 %180  ;;  %v208_v23 = vsel %vm185_vm2, %v203_v21, 0 }
 0x224   :  { %v974_v24 = vpop.eup %725  ;;  %v187_v25 = vsel %vm185_vm2, %v181_v22, 0 }
 0x225   :  { %196 = vmatpush.bf16.msra.mxu3 %v187_v25  ;;  %v171_v26 = vsel %vm110_vm1, %v974_v24, 0.0 }
 0x226   :  { %v979_v27 = vpop.eup %727  ;;  %172 = vadd.xlane.f32.xlu0 %v171_v26 }
 0x227   :  { %v288_v28 = vsel %vm110_vm1, %v979_v27, 0.0 }
 0x228   :  { %289 = vadd.xlane.f32.xlu2 %v288_v28 }
 0x229   :  { %217 = vmatpush.bf16.msrb.mxu3 %v208_v23 }
 0x22a   :  { %v319_v31 = vpop.permute.xlu1 %318 }
 0x22c   :  { %v298_v29 = vpop.permute.xlu0 %297 }
 0x22d   :  { %v303_v30 = vsel %vm185_vm2, %v298_v29, 0 }
 0x22e   :  { %312 = vmatpush.bf16.msrb.mxu2 %v303_v30 }
 0x231   :  { %443 = vrot.lane.b32.xlu1 %v922_v12, %s870_s13 }
 0x240   :  { %422 = vrot.lane.b32.xlu2 %v917_v8, %s870_s13 }
 0x255   :  { %v528_v32 = vpop.xlane.xlu1 %527 }
 0x256   :  { %v530_v33 = vsub.f32 %v522_v59, %v528_v32 }
 0x257   :  { %v403_v34 = vpop.xlane.xlu0 %402 }
 0x258   :  { %v405_v35 = vsub.f32 %v397_v60, %v403_v34  ;;  %v533_v37 = vmul.f32 1.442695, %v530_v33  ;;  %v324_v60 = vsel %vm185_vm2, %v319_v31, 0 }
 0x25a   :  { %v408_v36 = vmul.f32 1.442695, %v405_v35 }
 0x25c   :  { %729 = vpow2.f32 %v408_v36  ;;  %v400_v38 = vpop.xlane.xlu2 %399 }
 0x25d   :  { %v404_v39 = vsub.f32 %v396_v63, %v400_v38  ;;  %731 = vpow2.f32 %v533_v37 }
 0x25f   :  { %v406_v40 = vmul.f32 1.442695, %v404_v39  ;;  %v525_v41 = vpop.xlane.xlu0 %524 }
 0x260   :  { %v529_v42 = vsub.f32 %v521_v0, %v525_v41 }
 0x261   :  { %733 = vpow2.f32 %v406_v40 }
 0x262   :  { %v730_v43 = vpop.eup %729  ;;  %v531_v44 = vmul.f32 1.442695, %v529_v42 }
 0x263   :  { %v413_v45 = vsel %vm110_vm1, %v730_v43, 0.0  ;;  %v987_v46 = vpop.eup %731 }
 0x264   :  { %735 = vpow2.f32 %v531_v44  ;;  %414 = vadd.xlane.f32.xlu0 %v413_v45  ;;  %v538_v49 = vsel %vm110_vm1, %v987_v46, 0.0 }
 0x267   :  { %v734_v47 = vpop.eup %733 }
 0x268   :  { %v410_v48 = vsel %vm110_vm1, %v734_v47, 0.0 }
 0x269   :  { %411 = vadd.xlane.f32.xlu1 %v410_v48  ;;  %539 = vadd.xlane.f32.xlu2 %v538_v49  ;;  %v698_v48 = vld [vmem:[#allocation8] sm:$0xff] }
 0x26a   :  { %v736_v50 = vpop.eup %735 }
 0x26b   :  { %v535_v51 = vsel %vm110_vm1, %v736_v50, 0.0 }
 0x26c   :  { %536 = vadd.xlane.f32.xlu0 %v535_v51 }
 0x280   :  { %547 = vrot.lane.b32.xlu0 %v917_v8, %s871_s14 }
 0x282   :  { %568 = vrot.lane.b32.xlu1 %v922_v12, %s871_s14 }
 0x28a   :  { %v287_v52 = vpop.xlane.xlu0 %286 }
 0x28b   :  { %v170_v53 = vpop.xlane.xlu1 %169  ;;  %737 = vrcp.f32 %v287_v52 }
 0x28c   :  { %739 = vrcp.f32 %v170_v53 }
 0x291   :  { %v738_v54 = vpop.eup %737 }
 0x292   :  { %v740_v55 = vpop.eup %739  ;;  %v293_v56 = vmul.f32 %v738_v54, %v965_v10 }
 0x293   :  { %v176_v57 = vmul.f32 %v740_v55, %v967_v11 }
 0x294   :  { %v295_v58 = vpack.c.bf16 %v293_v56, %v293_v56  ;;  %v720_v56 = vld [vmem:[%s1032_s3] ss:$0 sm:$0xff] }
 0x295   :  { %v178_v59 = vpack.c.bf16 %v176_v57, %v176_v57 }
 0x296   :  { %677 = vmatmul.msk.bf16.vlgmr.msrb.gmra.mxu2 %vm110_vm1, %v295_v58 }
 0x297   :  { %673 = vmatmul.msk.bf16.vlgmr.msra.gmra.mxu3 %vm110_vm1, %v178_v59 }
 0x298   :  { %333 = vmatpush.bf16.msra.mxu3 %v324_v60 }
 0x299   :  { %v173_v8 = vpop.xlane.xlu0 %172 }
 0x29a   :  { %741 = vrcp.f32 %v173_v8 }
 0x29b   :  { %v290_v12 = vpop.xlane.xlu2 %289 }
 0x29c   :  { %743 = vrcp.f32 %v290_v12 }
 0x2a0   :  { %v742_v61 = vpop.eup %741 }
 0x2a1   :  { %v177_v62 = vmul.f32 %v742_v61, %v974_v24 }
 0x2a2   :  { %v744_v4 = vpop.eup %743 }
 0x2a3   :  { %v423_v63 = vpop.permute.xlu2 %422  ;;  %v444_v1 = vpop.permute.xlu1 %443  ;;  %v179_v2 = vpack.c.bf16 %v177_v62, %v177_v62  ;;  %v294_v5 = vmul.f32 %v744_v4, %v979_v27 }
 0x2a4   :  { %v428_v0 = vsel %vm185_vm2, %v423_v63, 0  ;;  %v449_v3 = vsel %vm185_vm2, %v444_v1, 0 }
 0x2a5   :  { %437 = vmatpush.bf16.msra.mxu2 %v428_v0  ;;  %v296_v6 = vpack.c.bf16 %v294_v5, %v294_v5 }
 0x2a7   :  { %674 = vmatmul.msk.bf16.vlgmr.msrb.gmra.mxu3 %vm110_vm1, %v179_v2 }
 0x2a8   :  { %458 = vmatpush.bf16.msrb.mxu3 %v449_v3 }
 0x2b7   :  { %678 = vmatmul.msk.bf16.vlgmr.msra.gmra.mxu3 %vm110_vm1, %v296_v6 }
 0x2d7   :  { %v415_v7 = vpop.xlane.xlu0 %414 }
 0x2d8   :  { %745 = vrcp.f32 %v415_v7 }
 0x2dc   :  { %v412_v9 = vpop.xlane.xlu1 %411  ;;  %v540_v16 = vpop.xlane.xlu2 %539 }
 0x2dd   :  { %747 = vrcp.f32 %v412_v9 }
 0x2de   :  { %v746_v10 = vpop.eup %745  ;;  %749 = vrcp.f32 %v540_v16 }
 0x2df   :  { %v419_v11 = vmul.f32 %v746_v10, %v730_v43  ;;  %v537_v18 = vpop.xlane.xlu0 %536 }
 0x2e0   :  { %751 = vrcp.f32 %v537_v18 }
 0x2e1   :  { %v421_v13 = vpack.c.bf16 %v419_v11, %v419_v11 }
 0x2e3   :  { %682 = vmatmul.msk.bf16.vlgmr.msrb.gmra.mxu3 %vm110_vm1, %v421_v13  ;;  %v748_v14 = vpop.eup %747 }
 0x2e4   :  { %v418_v15 = vmul.f32 %v748_v14, %v734_v47  ;;  %v750_v19 = vpop.eup %749  ;;  %v699_v47 = vld [vmem:[#allocation8 + $0x8] sm:$0xff] }
 0x2e5   :  { %v544_v22 = vmul.f32 %v750_v19, %v987_v46  ;;  %632 = vmatpush.bf16.msra.mxu0 %v699_v47 }
 0x2e6   :  { %v420_v17 = vpack.c.bf16 %v418_v15, %v418_v15  ;;  %v752_v20 = vpop.eup %751 }
 0x2e7   :  { %v543_v23 = vmul.f32 %v752_v20, %v736_v50  ;;  %v546_v27 = vpack.c.bf16 %v544_v22, %v544_v22 }
 0x2e8   :  { %681 = vmatmul.msk.bf16.vlgmr.msra.gmra.mxu2 %vm110_vm1, %v420_v17 }
 0x2e9   :  { %v545_v28 = vpack.c.bf16 %v543_v23, %v543_v23  ;;  %633 = vmatpush.bf16.msra.mxu0 %v698_v48 }
 0x2f2   :  { %v548_v21 = vpop.permute.xlu0 %547 }
 0x2f3   :  { %v553_v24 = vsel %vm185_vm2, %v548_v21, 0 }
 0x2f4   :  { %v569_v25 = vpop.permute.xlu1 %568  ;;  %562 = vmatpush.bf16.msrb.mxu2 %v553_v24 }
 0x2f5   :  { %v574_v26 = vsel %vm185_vm2, %v569_v25, 0 }
 0x2f6   :  { %583 = vmatpush.bf16.msra.mxu3 %v574_v26 }
 0x2f8   :  { %685 = vmatmul.msk.bf16.vlgmr.msrb.gmra.mxu2 %vm110_vm1, %v545_v28 }
 0x2f9   :  { %686 = vmatmul.msk.bf16.vlgmr.msra.gmra.mxu3 %vm110_vm1, %v546_v27 }
 0x319   :  { %v314_v29 = vpop.f32.mrf.mxu2 }
 0x31a   :  { %v198_v30 = vpop.f32.mrf.mxu3  ;;  %341 = vrot.lane.b32.xlu0 %v314_v29, %s860_s1 }
 0x31b   :  { %223 = vst.msk [vmem:[#allocation2] sm:$0xff] %vm110_vm1, %v198_v30 }
 0x321   :  { %v316_v31 = vpop.f32.mrf.mxu2 }
 0x322   :  { %v200_v32 = vpop.f32.mrf.mxu3 }
 0x32a   :  { %v219_v33 = vpop.f32.mrf.mxu3 }
 0x32b   :  { %224 = vst.msk [vmem:[#allocation2 + $0x8] sm:$0xff] %vm110_vm1, %v219_v33 }
 0x332   :  { %v221_v34 = vpop.f32.mrf.mxu3 }
 0x33a   :  { %v335_v35 = vpop.f32.mrf.mxu3 }
 0x33b   :  { %343 = vrot.lane.b32.xlu1 %v335_v35, %s860_s1 }
 0x342   :  { %v337_v36 = vpop.f32.mrf.mxu3 }
 0x366   :  { %v460_v37 = vpop.f32.mrf.mxu3 }
 0x367   :  { %468 = vrot.lane.b32.xlu1 %v460_v37, %s872_s15 }
 0x36b   :  { %v439_v38 = vpop.f32.mrf.mxu2 }
 0x36c   :  { %466 = vrot.lane.b32.xlu0 %v439_v38, %s872_s15 }
 0x36e   :  { %v462_v39 = vpop.f32.mrf.mxu3 }
 0x373   :  { %v441_v40 = vpop.f32.mrf.mxu2 }
 0x37b   :  { %v564_v41 = vpop.f32.mrf.mxu2 }
 0x37c   :  { %v585_v42 = vpop.f32.mrf.mxu3  ;;  %591 = vrot.lane.b32.xlu2 %v564_v41, %s873_s16 }
 0x37d   :  { %593 = vrot.lane.b32.xlu0 %v585_v42, %s873_s16 }
 0x383   :  { %v566_v43 = vpop.f32.mrf.mxu2 }
 0x384   :  { %v587_v44 = vpop.f32.mrf.mxu3 }
 0x38c   :  { %v342_v45 = vpop.permute.xlu0 %341 }
 0x38d   :  { %348 = vst.msk [vmem:[#allocation2] sm:$0xff] %vm347_vm3, %v342_v45 }
 0x3ad   :  { %v344_v46 = vpop.permute.xlu1 %343 }
 0x3ae   :  { %349 = vst.msk [vmem:[#allocation2 + $0x8] sm:$0xff] %vm347_vm3, %v344_v46 }
 0x3d6   :  { %v592_v51 = vpop.permute.xlu2 %591 }
 0x3d9   :  { %v469_v49 = vpop.permute.xlu1 %468 }
 0x3da   :  { %474 = vst.msk [vmem:[#allocation2 + $0x8] sm:$0xff] %vm472_vm4, %v469_v49 }
 0x3de   :  { %v467_v50 = vpop.permute.xlu0 %466 }
 0x3df   :  { %473 = vst.msk [vmem:[#allocation2] sm:$0xff] %vm472_vm4, %v467_v50 }
 0x3e0   :  { %598 = vst.msk [vmem:[#allocation2] sm:$0xff] %vm597_vm5, %v592_v51 }
 0x3e7   :  { %v600_v53 = vld [vmem:[#allocation2] sm:$0xff] }
 0x3ef   :  { %v594_v52 = vpop.permute.xlu0 %593 }
 0x3f0   :  { %599 = vst.msk [vmem:[#allocation2 + $0x8] sm:$0xff] %vm597_vm5, %v594_v52 }
 0x3f7   :  { %v601_v54 = vld [vmem:[#allocation2 + $0x8] sm:$0xff] }
 0x3f8   :  { %v602_v55 = vpack.c.bf16 %v601_v54, %v600_v53 }
 0x3fa   :  { %695 = vmatmul.msk.bf16.vlgmr.msra.gmra.mxu0 %vm85_vm0, %v602_v55 }
 0x477   :  { %v635_v57 = vpop.f32.mrf.mxu0 }
 0x478   :  { %v636_v58 = vadd.f32 %v720_v56, %v635_v57 }
 0x47a   :  { %640 = vst.msk [vmem:[#allocation9] sm:$0xff] %vm85_vm0, %v636_v58 }
 0x47f   :  { %v637_v59 = vpop.f32.mrf.mxu0 }
 0x480   :  { %v638_v60 = vadd.f32 %v720_v56, %v637_v59 }
 0x482   :  { %641 = vst.msk [vmem:[#allocation9 + $0x8] sm:$0xff] %vm85_vm0, %v638_v60 }
 0x483   :  { %654 = dma.vmem_to_hbm [thread:$0]  %s647_s20, 256, %s649_s23, [#allocation5], %s859_s27, %s859_s27, %s860_s1  }
 0x484   :  { %853 = dma.done.wait [#allocation5], 256  }
 0x485   :  { %854 = vsyncadd [#allocation5], 4294967040 }
 0x486   :  { %659 = vsyncpa [#allocation4], 1 }
 0x487   :  { %660 = vsyncpa [#allocation7], 1 }
 0x488   :  { %661 = vsyncpa [#allocation5], 1 }

</bundles_post_ra>
